<compile_context>
chip_gen: v7x
topology: tpu7x:2x2x1
jax: 0.10.0
libtpu: 0.0.40
codegen_flags: <defaults>
</compile_context>

<pallas_src>
import jax
import jax.numpy as jnp
from jax.experimental import pallas as pl
from jax.experimental.pallas import tpu as pltpu


def _identity_copy_kernel(x_hbm, o_hbm, sem):
    # One whole-array HBM->HBM DMA: no grid, no VMEM staging, no per-step overhead.
    cp = pltpu.make_async_copy(x_hbm, o_hbm, sem)
    cp.start()
    cp.wait()


def _pallas_identity_copy(x):
    """Materialize a fresh copy of `x` via a single direct HBM->HBM DMA."""
    return pl.pallas_call(
        _identity_copy_kernel,
        out_shape=jax.ShapeDtypeStruct(x.shape, x.dtype),
        in_specs=[pl.BlockSpec(memory_space=pl.ANY)],   # raw HBM ref, no auto-DMA/tiling
        out_specs=pl.BlockSpec(memory_space=pl.ANY),
        scratch_shapes=[pltpu.SemaphoreType.DMA],
    )(x)


def input_adapter_forward(x, force_kernel=False):
    """Pallas equivalent of InputAdapter.forward: identity + unsqueeze(0).

    Default path: zero-cost metadata reshape (the op moves no data, so not moving data
    is the whole optimization).  force_kernel=True returns a freshly materialized buffer
    produced by a single whole-array HBM->HBM DMA kernel, for any input shape.
    """
    out_shape = (1,) + tuple(x.shape)

    total = 1
    for d in x.shape:
        total *= d

    if not force_kernel or total == 0 or x.ndim == 0:
        # unsqueeze(0) is free; degenerate (empty / 0-d) inputs also take the metadata path.
        return jnp.reshape(x, out_shape)

    out = _pallas_identity_copy(x)
    # Adding a leading size-1 dim on a contiguous array is a metadata-only reshape.
    return jnp.reshape(out, out_shape)

# TODO(synk): the original module's numpy conversion and `.to(device)` placement are
# host/framework concerns with no in-kernel equivalent; JAX array placement handles them.


if __name__ == "__main__":
    key = jax.random.PRNGKey(0)
    # Small NCHW-style input consistent with a typical DQN observation batch.
    x = jax.random.normal(key, (2, 4, 16, 16), dtype=jnp.float32)

    # Default (fast, metadata-only) path.
    y_fast = input_adapter_forward(x)
    y_fast = jax.block_until_ready(y_fast)
    assert y_fast.shape == (1, 2, 4, 16, 16), y_fast.shape
    assert y_fast.dtype == x.dtype
    assert bool(jnp.all(y_fast[0] == x))

    # force_kernel path: single HBM->HBM DMA copy, then free unsqueeze.
    y_kernel = input_adapter_forward(x, force_kernel=True)
    y_kernel = jax.block_until_ready(y_kernel)
    assert y_kernel.shape == (1, 2, 4, 16, 16), y_kernel.shape
    assert y_kernel.dtype == x.dtype
    assert bool(jnp.all(y_kernel[0] == x))

    # Also exercise a "ragged" shape that the previous version silently refused to copy.
    x_ragged = jax.random.normal(key, (3, 5, 7), dtype=jnp.float32)
    y_ragged = input_adapter_forward(x_ragged, force_kernel=True)
    y_ragged = jax.block_until_ready(y_ragged)
    assert y_ragged.shape == (1, 3, 5, 7), y_ragged.shape
    assert bool(jnp.all(y_ragged[0] == x_ragged))

    print("KERNEL_OK")
</pallas_src>

<mosaic_0001>
module attributes {stable_mosaic.version = 11 : i64} {
  func.func @_identity_copy_kernel(%arg0: memref<2x4x16x16xf32, #tpu.memory_space<any>>, %arg1: memref<2x4x16x16xf32, #tpu.memory_space<any>>, %arg2: memref<!tpu.dma_semaphore, #tpu.memory_space<semaphore_mem>>) attributes {dimension_semantics = [], scalar_prefetch = 0 : i64, scratch_operands = 1 : i64, tpu.core_type = #tpu.core_type<tc>} {
    tpu.enqueue_dma source(%arg0 : memref<2x4x16x16xf32, #tpu.memory_space<any>>) target(%arg1 : memref<2x4x16x16xf32, #tpu.memory_space<any>>) target_semaphore(%arg2 : memref<!tpu.dma_semaphore, #tpu.memory_space<semaphore_mem>>)
    tpu.wait_dma2 semaphore(%arg2 : memref<!tpu.dma_semaphore, #tpu.memory_space<semaphore_mem>>) src(%arg0 : memref<2x4x16x16xf32, #tpu.memory_space<any>>) dst(%arg1 : memref<2x4x16x16xf32, #tpu.memory_space<any>>)
    return
  }
}

</mosaic_0001>

<bundles_post_ra>
// kernel: tpu_custom_call.1
= control target key start
LH: loop header
LB: loop body
LE: loop exit
PB: predicated region body
PF: predicated region fallthrough
CT: control target
= control target key end

     0   :  { %s36_s6 = smov [#allocation2]   ;;  %s37_s7 = smov [#allocation3]   ;;  %s55_s0 = inlined_call_operand.hbm [shape: f32[2,4,16,16], index: 0, kind: input, shape index: {}]   ;;  %s56_s1 = inlined_call_operand.hbm [shape: f32[2,4,16,16], index: 1, kind: output, shape index: {}]  }
   0x1   :  { %s38_s8 = smov 0  }
   0x2   :  { %18 = dma.general %s55_s0, 2048, %s56_s1, %s36_s6, %s37_s7, [#allocation4], %s38_s8, 0  }
   0x3   :  { %34 = dma.done.wait [#allocation2], 2048 }
   0x4   :  { %35 = vsyncadd [#allocation2], 4294965248 }
   0x5   :  { %24 = vsyncmov [#allocation2] }
   0x8   :  { %s25_s13 = vpop.sfrf %24 }
   0x9   :  { %p30_p0 = scmp.ne.s32.totalorder %s25_s13, 0 }
   0xb   :  { %29 = shalt.err (%p30_p0)  }

</bundles_post_ra>
